<compile_context>
chip_gen: v5e
topology: v5e:2x2
jax: 0.10.0
libtpu: 0.0.40
codegen_flags: <defaults>
</compile_context>

<pallas_src>
import math
from functools import partial

import numpy as np
import jax
import jax.numpy as jnp
from jax.experimental import pallas as pl
from jax.experimental.pallas import tpu as pltpu

LRELU_SLOPE = 0.1
BANDS = [(0.0, 0.1), (0.1, 0.25), (0.25, 0.5), (0.5, 0.75), (0.75, 1.0)]

# fmaps layout: NHWC by default (elementwise feature-matching losses are layout
# invariant).  Flip to True to emit torch-style NCHW fmaps (adds transposes).
FMAPS_NCHW = False


def _round_up(x, m):
    return ((x + m - 1) // m) * m


def _tpu_vmem_capacity_bytes():
    try:
        info = pltpu.get_tpu_info()
        cap = getattr(info, "vmem_capacity_bytes", None)
        if cap:
            return int(cap)
    except Exception:
        pass
    return 64 * 1024 * 1024     # conservative fallback == v7x per-TC VMEM


_VMEM_CAP = _tpu_vmem_capacity_bytes()
_VMEM_LIMIT = int(_VMEM_CAP * 0.75)     # scoped VMEM handed to each pallas_call
_TILE_BUDGET = int(_VMEM_CAP * 0.60)    # conservative double-buffer accounting


# ---------------------------------------------------------------------------
# Pallas kernel 1: tiled matmul + bias + (optional) LeakyReLU
#   bf16 A/B on the MXU, f32 accumulation, cast to out dtype on the final store
# ---------------------------------------------------------------------------
def _mm_kernel_single_k(a_ref, b_ref, bias_ref, o_ref, *, slope):
    y = jnp.dot(a_ref[...], b_ref[...], preferred_element_type=jnp.float32)
    y = y + bias_ref[...]
    if slope is not None:
        y = jnp.maximum(y, slope * y)
    o_ref[...] = y.astype(o_ref.dtype)


def _mm_kernel_multi_k(a_ref, b_ref, bias_ref, o_ref, acc_ref, *, slope):
    k = pl.program_id(2)

    @pl.when(k == 0)
    def _():
        acc_ref[...] = jnp.zeros_like(acc_ref)

    acc_ref[...] += jnp.dot(a_ref[...], b_ref[...],
                            preferred_element_type=jnp.float32)

    @pl.when(k == pl.num_programs(2) - 1)
    def _():
        y = acc_ref[...] + bias_ref[...]
        if slope is not None:
            y = jnp.maximum(y, slope * y)
        o_ref[...] = y.astype(o_ref.dtype)


def _pick_tiles(M, K, N, out_bytes):
    """Prefer bn = full N (weight panel fetched once) and single-block K, then
    the largest bm that fits the per-generation VMEM budget."""
    budget = _TILE_BUDGET

    def usage(bm, bk, bn, nk):
        u = 2 * bm * bk * 2            # A blocks, bf16, double-buffered
        u += 2 * bk * bn * 2           # B blocks, bf16, double-buffered
        u += 2 * bm * bn * out_bytes   # out blocks, double-buffered
        u += 2 * bn * 4                # bias
        if nk > 1:
            u += bm * bn * 4           # f32 accumulator scratch
        return u

    bn_opts = [N] + [n for n in (1024, 512, 256, 128) if n < N]
    bk_opts = ([K] if K <= 8192 else []) + [k for k in (2048, 1024, 512) if k < K]
    bm_opts = (1024, 512, 256, 128, 64, 32, 16, 8)
    for bn in bn_opts:
        for bk in bk_opts:
            nk = -(-K // bk)
            for bm_c in bm_opts:
                bm = M if M <= bm_c else bm_c
                if usage(bm, bk, bn, nk) <= budget:
                    return bm, bk, bn, nk
    return min(M, 128), min(K, 512), min(N, 128), -(-K // 512)


def matmul_bias_act(a, b, bias=None, slope=None, out_dtype=jnp.bfloat16):
    """y = (leaky_relu)(a @ b + bias).  a/b in bf16 on the MXU, f32 accumulation,
    cast to `out_dtype` on the final store.  Ragged M/N edge blocks are handled
    by the cdiv grid; K is a single full block whenever the budget allows."""
    M, K = a.shape
    K2, N = b.shape
    assert K == K2
    a = a.astype(jnp.bfloat16)
    b = b.astype(jnp.bfloat16)
    if bias is None:
        bias2 = jnp.zeros((1, N), jnp.float32)
    else:
        bias2 = bias.reshape(1, N).astype(jnp.float32)

    out_bytes = jnp.dtype(out_dtype).itemsize
    bm, bk, bn, nk = _pick_tiles(M, K, N, out_bytes)
    if nk > 1:                                   # rare fallback: zero-pad K
        Kp = nk * bk
        a = jnp.pad(a, ((0, 0), (0, Kp - K)))
        b = jnp.pad(b, ((0, Kp - K), (0, 0)))

    grid = (pl.cdiv(M, bm), pl.cdiv(N, bn), nk)
    in_specs = [
        pl.BlockSpec((bm, bk), lambda i, j, k: (i, k)),
        pl.BlockSpec((bk, bn), lambda i, j, k: (k, j)),
        pl.BlockSpec((1, bn), lambda i, j, k: (0, j)),
    ]
    out_spec = pl.BlockSpec((bm, bn), lambda i, j, k: (i, j))
    if nk == 1:
        kernel = partial(_mm_kernel_single_k, slope=slope)
        scratch = []
    else:
        kernel = partial(_mm_kernel_multi_k, slope=slope)
        scratch = [pltpu.VMEM((bm, bn), jnp.float32)]

    return pl.pallas_call(
        kernel,
        out_shape=jax.ShapeDtypeStruct((M, N), out_dtype),
        grid_spec=pltpu.PrefetchScalarGridSpec(
            num_scalar_prefetch=0,
            grid=grid,
            in_specs=in_specs,
            out_specs=out_spec,
            scratch_shapes=scratch,
        ),
        compiler_params=pltpu.CompilerParams(
            dimension_semantics=("parallel", "parallel", "arbitrary"),
            vmem_limit_bytes=_VMEM_LIMIT),
    )(a, b, bias2)


# ---------------------------------------------------------------------------
# Pallas kernel 2: preprocess (mean removal + peak normalisation), row-tiled
# ---------------------------------------------------------------------------
def _preprocess_kernel(x_ref, o_ref):
    x = x_ref[...]
    x = x - jnp.mean(x, axis=-1, keepdims=True)
    m = jnp.max(jnp.abs(x), axis=-1, keepdims=True)
    o_ref[...] = 0.8 * x / (m + 1e-9)


def preprocess(x):
    """x: (B, 1, T).  x - mean, then 0.8 * x / (max|x| + 1e-9) along last dim."""
    # TODO(synk): for extremely long T a two-pass (tiled mean/max) variant would
    # bound VMEM further; rows are whole here because reductions are per-row.
    B, C, T = x.shape
    R = B * C
    x2 = x.reshape(R, T).astype(jnp.float32)
    br = R if R <= 8 else 8
    y = pl.pallas_call(
        _preprocess_kernel,
        out_shape=jax.ShapeDtypeStruct((R, T), jnp.float32),
        grid_spec=pltpu.PrefetchScalarGridSpec(
            num_scalar_prefetch=0,
            grid=(pl.cdiv(R, br),),
            in_specs=[pl.BlockSpec((br, T), lambda i: (i, 0))],
            out_specs=pl.BlockSpec((br, T), lambda i: (i, 0)),
        ),
        compiler_params=pltpu.CompilerParams(
            dimension_semantics=("parallel",),
            vmem_limit_bytes=_VMEM_LIMIT),
    )(x2)
    return y.reshape(B, C, T)


# ---------------------------------------------------------------------------
# STFT: framing once in bf16 + window-folded DFT panel through the matmul kernel
#   (full-width MXU dots, bounded VMEM per block, lane-dense padded output)
# ---------------------------------------------------------------------------
def stft_features(x, window_length, dftw):
    """Reproduces audiotools AudioSignal.stft (hann, match_stride=True, reflect)
    followed by view_as_real + rearrange 'b 1 f t c -> b c t f', returned NHWC."""
    hop = window_length // 4
    B, C, T = x.shape
    assert C == 1
    right_pad = int(math.ceil(T / hop) * hop - T)
    pad = (window_length - hop) // 2
    xp = jnp.pad(x, ((0, 0), (0, 0), (pad, pad + right_pad)), mode='reflect')
    # torch.stft(center=True) reflect-pads n_fft//2 on both sides
    xp = jnp.pad(xp, ((0, 0), (0, 0), (window_length // 2, window_length // 2)),
                 mode='reflect')
    BC = B * C
    L = xp.shape[-1]                    # multiple of hop by construction
    n_chunks = L // hop
    n_frames = n_chunks - 3
    xc = xp.reshape(BC, n_chunks, hop)
    # frame fi = [chunk fi | fi+1 | fi+2 | fi+3]  (one-time bf16 materialization)
    frames = jnp.concatenate([xc[:, s:s + n_frames, :] for s in range(4)], axis=-1)
    frames = frames.reshape(BC * n_frames, window_length).astype(jnp.bfloat16)

    nb2p = dftw.shape[-1]               # 2*n_bins padded to a multiple of 128
    n_bins = window_length // 2 + 1
    spec = matmul_bias_act(frames, dftw, bias=None, slope=None,
                           out_dtype=jnp.bfloat16)           # (BC*T_f, nb2p)
    spec = spec.reshape(B, n_frames, nb2p)[:, :, :2 * n_bins]
    spec = spec.reshape(B, n_frames, 2, n_bins)[:, 2:-2]      # match_stride drop
    return jnp.transpose(spec, (0, 1, 3, 2))                  # NHWC: (B, t, f, 2)


# ---------------------------------------------------------------------------
# Conv2d = im2col (bf16, single materialization) + Pallas matmul kernel
# ---------------------------------------------------------------------------
def conv2d(x_nhwc, w_oihw, bias, stride, padding, slope=None,
           out_dtype=jnp.bfloat16):
    # TODO(synk): im2col patches are still materialized once in HBM (bf16);
    # fully folding the KH*KW taps into the matmul K-grid (tap-shifted index
    # maps + stride phases) would remove the remaining 5-27x patch blow-up.
    B, H, W, Cin = x_nhwc.shape
    Cout, Cin2, KH, KW = w_oihw.shape
    assert Cin == Cin2
    SH, SW = stride
    PH, PW = padding
    xp = jnp.pad(x_nhwc.astype(jnp.bfloat16),
                 ((0, 0), (PH, PH), (PW, PW), (0, 0)))
    OH = (H + 2 * PH - KH) // SH + 1
    OW = (W + 2 * PW - KW) // SW + 1
    cols = []
    for i in range(KH):
        for j in range(KW):
            cols.append(xp[:, i:i + SH * (OH - 1) + 1:SH,
                           j:j + SW * (OW - 1) + 1:SW, :])
    patches = jnp.concatenate(cols, axis=-1).reshape(B * OH * OW, KH * KW * Cin)
    w_mat = jnp.transpose(w_oihw, (2, 3, 1, 0)).reshape(KH * KW * Cin, Cout)

    bias_v = bias
    n_out = Cout
    if Cout < 8:
        # Lane-dense store fix for the Cout==1 conv_post: pad output channels to
        # 128 zero columns (unmasked vst, dense MXU lanes) and slice afterwards.
        n_out = 128
        w_mat = jnp.pad(w_mat, ((0, 0), (0, n_out - Cout)))
        bias_v = jnp.pad(bias, (0, n_out - Cout))

    y = matmul_bias_act(patches, w_mat, bias_v, slope=slope, out_dtype=out_dtype)
    if n_out != Cout:
        y = y[:, :Cout]
    return y.reshape(B, OH, OW, Cout)


def _store_fmap(fmap, h_nhwc):
    fmap.append(jnp.transpose(h_nhwc, (0, 3, 1, 2)) if FMAPS_NCHW else h_nhwc)


# ---------------------------------------------------------------------------
# MPD (multi-period discriminator)
# ---------------------------------------------------------------------------
def mpd_forward(params, x, period):
    B, C, T = x.shape
    # NOTE: matches the reference pad_to_period exactly: F.pad(x, (0, p - t % p))
    # pads a full period even when T % period == 0.
    pad = period - T % period
    x = jnp.pad(x, ((0, 0), (0, 0), (0, pad)), mode='reflect')
    L = x.shape[-1] // period
    xh = x.reshape(B, C, L, period)                 # b c l p  (NCHW)
    h = jnp.transpose(xh, (0, 2, 3, 1))             # NHWC: (B, L, period, 1)
    fmap = []
    for (w, b, stride, padding) in params['convs']:
        h = conv2d(h, w, b, stride, padding, slope=LRELU_SLOPE,
                   out_dtype=jnp.bfloat16)
        _store_fmap(fmap, h)
    w, b, stride, padding = params['conv_post']
    h = conv2d(h, w, b, stride, padding, slope=None, out_dtype=jnp.float32)
    _store_fmap(fmap, h)
    y = h.reshape(B, -1)     # Cout == 1 -> same ordering as torch.flatten on NCHW
    return y, fmap


# ---------------------------------------------------------------------------
# MRSD (multi-resolution spectrogram discriminator)
# ---------------------------------------------------------------------------
def mrsd_forward(params, x, window_length):
    spec_nhwc = stft_features(x, window_length, params['dftw'])   # (B, t, f, 2)
    n_bins = window_length // 2 + 1
    bands = [(int(lo * n_bins), int(hi * n_bins)) for lo, hi in BANDS]
    fmap = []
    outs = []
    # TODO(synk): bands with equal freq width could be batched into one matmul
    # per layer (stacked weights + band grid axis) to cut pallas_call count.
    for band_idx, (lo, hi) in enumerate(bands):
        h = spec_nhwc[:, :, lo:hi, :]
        for (w, b, stride, padding) in params['band_convs'][band_idx]:
            h = conv2d(h, w, b, stride, padding, slope=LRELU_SLOPE,
                       out_dtype=jnp.bfloat16)
            _store_fmap(fmap, h)
        outs.append(h)
    h = jnp.concatenate(outs, axis=2)                # cat along freq (dim=-1 NCHW)
    w, b, stride, padding = params['conv_post']
    h = conv2d(h, w, b, stride, padding, slope=None, out_dtype=jnp.float32)
    y = h.reshape(h.shape[0], -1)    # Cout == 1 -> same ordering as torch flatten
    return y, fmap


# ---------------------------------------------------------------------------
# Deterministic parameter init (weight_norm is an identity reparam at forward)
# ---------------------------------------------------------------------------
def _init_conv(key, cout, cin, kh, kw):
    kw_, kb = jax.random.split(key)
    scale = 1.0 / math.sqrt(cin * kh * kw)
    w = scale * jax.random.normal(kw_, (cout, cin, kh, kw), jnp.float32)
    b = scale * jax.random.normal(kb, (cout,), jnp.float32)
    return w, b


def make_mpd_params(key, d_mult, kernel_size=5, stride=3):
    chans = [1, int(32 * d_mult), int(128 * d_mult), int(512 * d_mult),
             int(1024 * d_mult), int(1024 * d_mult)]
    convs = []
    for i in range(5):
        cin, cout = chans[i], chans[i + 1]
        st = (stride, 1) if i < 4 else (1, 1)
        w, b = _init_conv(jax.random.fold_in(key, i), cout, cin, kernel_size, 1)
        convs.append((w, b, st, (2, 0)))             # get_padding(5,1) = 2
    wp, bp = _init_conv(jax.random.fold_in(key, 10), 1, chans[-1], 3, 1)
    return {'convs': convs, 'conv_post': (wp, bp, (1, 1), (1, 0))}


def make_dftw(window_length):
    """Window-folded real/imag DFT panel (win, 2*n_bins padded to 128), bf16."""
    n_bins = window_length // 2 + 1
    n = np.arange(window_length)[:, None].astype(np.float64)
    k = np.arange(n_bins)[None, :].astype(np.float64)
    ang = 2.0 * np.pi * ((n * k) % window_length) / float(window_length)
    dft = np.concatenate([np.cos(ang), -np.sin(ang)], axis=1)    # (win, 2*n_bins)
    hann = 0.5 * (1.0 - np.cos(2.0 * np.pi * np.arange(window_length)
                               / window_length))                 # periodic hann
    dftw = hann[:, None] * dft
    nb2 = 2 * n_bins
    nb2p = _round_up(nb2, 128)             # lane-dense output stores
    dftw = np.pad(dftw, ((0, 0), (0, nb2p - nb2)))
    return jnp.asarray(dftw, jnp.bfloat16)


def make_mrsd_params(key, window_length, ch=32):
    band_convs = []
    for bi in range(len(BANDS)):
        kk = jax.random.fold_in(key, bi)
        layers = [(*_init_conv(jax.random.fold_in(kk, 0), ch, 2, 3, 9), (1, 1), (1, 4))]
        for j in range(1, 4):
            layers.append((*_init_conv(jax.random.fold_in(kk, j), ch, ch, 3, 9), (1, 2), (1, 4)))
        layers.append((*_init_conv(jax.random.fold_in(kk, 4), ch, ch, 3, 3), (1, 1), (1, 1)))
        band_convs.append(layers)
    wp, bp = _init_conv(jax.random.fold_in(key, 100), 1, ch, 3, 3)
    return {'band_convs': band_convs,
            'conv_post': (wp, bp, (1, 1), (1, 1)),
            'dftw': make_dftw(window_length)}


# ---------------------------------------------------------------------------
# Discriminator
# ---------------------------------------------------------------------------
class Discriminator:
    def __init__(self, periods, discriminator_channel_mult, use_spectral_norm, key):
        # TODO(synk): spectral_norm power iteration not implemented; use_spectral_norm=False
        # (weight_norm/spectral_norm only reparametrize weights; synthetic init uses
        #  the effective weights directly).
        self.periods = list(periods)
        self.window_lengths = [2048, 1024, 512]
        self.mpd_params = [make_mpd_params(jax.random.fold_in(key, 100 + i),
                                           discriminator_channel_mult)
                           for i, _ in enumerate(self.periods)]
        self.mrsd_params = [make_mrsd_params(jax.random.fold_in(key, 200 + i), wl)
                            for i, wl in enumerate(self.window_lengths)]

    def forward(self, x):
        x = preprocess(x)
        ys, fmaps = [], []
        for p, prm in zip(self.periods, self.mpd_params):
            y, f = mpd_forward(prm, x, p)
            ys.append(y)
            fmaps.append(f)
        for wl, prm in zip(self.window_lengths, self.mrsd_params):
            y, f = mrsd_forward(prm, x, wl)
            ys.append(y)
            fmaps.append(f)
        return ys, fmaps


if __name__ == "__main__":
    key = jax.random.PRNGKey(0)
    xkey, pkey = jax.random.split(key)
    B, T = 2, 1600                     # small audio batch: (B, 1, T)
    x = jax.random.normal(xkey, (B, 1, T), jnp.float32)

    disc = Discriminator(periods=[2, 3], discriminator_channel_mult=1,
                         use_spectral_norm=False, key=pkey)
    ys, fmaps = disc.forward(x)
    (ys, fmaps) = jax.block_until_ready((ys, fmaps))

    assert len(ys) == 2 + 3
    assert all(bool(jnp.all(jnp.isfinite(y.astype(jnp.float32)))) for y in ys)
    assert all(bool(jnp.all(jnp.isfinite(f.astype(jnp.float32))))
               for fm in fmaps for f in fm)
    print("KERNEL_OK")
</pallas_src>

<mosaic_0001>
module attributes {stable_mosaic.version = 11 : i64} {
  func.func @_preprocess_kernel(%arg0: i32, %arg1: memref<2x1600xf32, #tpu.memory_space<vmem>>, %arg2: memref<2x1600xf32, #tpu.memory_space<vmem>>) attributes {dimension_semantics = [#tpu.dimension_semantics<parallel>], iteration_bounds = array<i64: 1>, scalar_prefetch = 0 : i64, scratch_operands = 0 : i64, tpu.core_type = #tpu.core_type<tc>, window_params = [{transform_indices = @transform_0, window_bounds = array<i64: 2, 1600>}, {transform_indices = @transform_1, window_bounds = array<i64: 2, 1600>}]} {
    %c0 = arith.constant 0 : index
    %c0_0 = arith.constant 0 : index
    %0 = vector.load %arg1[%c0, %c0_0] : memref<2x1600xf32, #tpu.memory_space<vmem>>, vector<2x1600xf32>
    %cst = arith.constant dense<0.000000e+00> : vector<2xf32>
    %1 = vector.multi_reduction <add>, %0, %cst [1] : vector<2x1600xf32> to vector<2xf32>
    %2 = vector.shape_cast %1 : vector<2xf32> to vector<2x1xf32>
    %cst_1 = arith.constant 1.600000e+03 : f32
    %3 = vector.broadcast %cst_1 : f32 to vector<2x1xf32>
    %4 = arith.divf %2, %3 : vector<2x1xf32>
    %5 = vector.broadcast %4 : vector<2x1xf32> to vector<2x1600xf32>
    %6 = arith.subf %0, %5 : vector<2x1600xf32>
    %7 = math.absf %6 : vector<2x1600xf32>
    %cst_2 = arith.constant dense<0xFF800000> : vector<2xf32>
    %8 = vector.multi_reduction <maximumf>, %7, %cst_2 [1] : vector<2x1600xf32> to vector<2xf32>
    %9 = vector.shape_cast %8 : vector<2xf32> to vector<2x1xf32>
    %cst_3 = arith.constant 8.000000e-01 : f32
    %10 = vector.broadcast %cst_3 : f32 to vector<2x1600xf32>
    %11 = arith.mulf %10, %6 : vector<2x1600xf32>
    %cst_4 = arith.constant 9.99999971E-10 : f32
    %12 = vector.broadcast %cst_4 : f32 to vector<2x1xf32>
    %13 = arith.addf %9, %12 : vector<2x1xf32>
    %14 = vector.broadcast %13 : vector<2x1xf32> to vector<2x1600xf32>
    %15 = arith.divf %11, %14 : vector<2x1600xf32>
    %c0_5 = arith.constant 0 : index
    %c0_6 = arith.constant 0 : index
    %16 = vector.load %arg2[%c0_5, %c0_6] : memref<2x1600xf32, #tpu.memory_space<vmem>>, vector<2x1600xf32>
    tpu.vector_store %arg2[%c0_5, %c0_6], %15 {strides = array<i32>} : memref<2x1600xf32, #tpu.memory_space<vmem>>, vector<2x1600xf32>,
    return
  }
  func.func @transform_0(%arg0: i32) -> (i32, i32) {
    %c0_i32 = arith.constant 0 : i32
    %c0_i32_0 = arith.constant 0 : i32
    return %arg0, %c0_i32 : i32, i32
  }
  func.func @transform_1(%arg0: i32) -> (i32, i32) {
    %c0_i32 = arith.constant 0 : i32
    %c0_i32_0 = arith.constant 0 : i32
    return %arg0, %c0_i32 : i32, i32
  }
}

</mosaic_0001>

<bundles_post_ra>
// kernel: tpu_custom_call.1
= control target key start
LH: loop header
LB: loop body
LE: loop exit
PB: predicated region body
PF: predicated region fallthrough
CT: control target
= control target key end

     0   :  { %6 = vsyncpa [#allocation3], 0  ;;  %s360_s0 = inlined_call_operand.hbm [shape: f32[2,1600], index: 0, kind: input, shape index: {}]   ;;  %s361_s1 = inlined_call_operand.hbm [shape: f32[2,1600], index: 1, kind: output, shape index: {}]  }
   0x1   :  { %7 = vsyncpa [#allocation4], 0  ;;  %s13_s8 = sshll.u32 %s360_s0, 4  ;;  %s285_s9 = smov [#allocation2]   ;;  %s14_s8 = int_to_ptr.hbm [resolvable:$true] %s13_s8 }
   0x2   :  { %s15_s10 = sshll.u32 %s285_s9, 4  ;;  %s16_s10 = int_to_ptr.vmem [resolvable:$true] %s15_s10 }
   0x3   :  { %18 = dma.hbm_to_vmem [thread:$0]  %s14_s8, 416, %s16_s10, [#allocation3]  }
   0x4   :  { %281 = dma.done.wait [#allocation3], 416  }
   0x5   :  { %282 = vsyncadd [#allocation3], 4294966880  ;;  %v302_v0 = vld [vmem:[#allocation2] sm:$0xff]  ;;  %v304_v1 = vld [vmem:[#allocation2 + $0x8] sm:$0xff]  ;;  %vm62_vm0 = vcmask 1041408   ;;  %vm86_vm1 = vcmask 517120  }
   0x6   :  { %31 = vst [vmem:[#allocation1] ss:$4 sm:$0xff] %v302_v0  ;;  %v308_v2 = vld [vmem:[#allocation2 + $0x10] sm:$0xff]  ;;  %v310_v3 = vld [vmem:[#allocation2 + $0x18] sm:$0x3]  ;;  %v286_v42 = vmov 1600.0  }
   0x7   :  { %33 = vst [vmem:[#allocation1 + $0x20] ss:$4 sm:$0xff] %v304_v1  ;;  %229 = vrcp.f32 %v286_v42  ;;  %v287_v48 = vmov 269488144   ;;  %s288_s0 = smov [#allocation5]   ;;  %s215_s14 = sshll.u32 %s361_s1, 4  ;;  %s216_s14 = int_to_ptr.hbm [resolvable:$true] %s215_s14 }
   0x8   :  { %v101_v49 = vunpack.c.l.s4 %v287_v48  ;;  %s213_s11 = sshll.u32 %s288_s0, 4  ;;  %s214_s11 = int_to_ptr.vmem [resolvable:$true] %s213_s11 }
   0xa   :  { %v102_v51 = vunpack.c.0.s8 %v101_v49 }
   0xd   :  { %v34_v4 = vld.sshfl [vmem:[#allocation1] sm:$0xff pattern:$0x73625140]  ;;  %v35_v5 = vld.sshfl [vmem:[#allocation1 + $0x8] sm:$0xff pattern:$0x73625140]  ;;  %v230_v43 = vpop.eup %229 }
   0xe   :  { %v36_v6 = vld.sshfl [vmem:[#allocation1 + $0x10] sm:$0xff pattern:$0x73625140]  ;;  %v37_v7 = vld.sshfl [vmem:[#allocation1 + $0x18] sm:$0xff pattern:$0x73625140]  ;;  %vm96_vm2 = vweird.f32 %v230_v43 }
   0xf   :  { %v38_v8 = vld.sshfl [vmem:[#allocation1 + $0x20] sm:$0xff pattern:$0x73625140]  ;;  %v39_v9 = vld.sshfl [vmem:[#allocation1 + $0x28] sm:$0xff pattern:$0x73625140] }
  0x10   :  { %v40_v10 = vld.sshfl [vmem:[#allocation1 + $0x30] sm:$0xff pattern:$0x73625140]  ;;  %v41_v11 = vld.sshfl [vmem:[#allocation1 + $0x38] sm:$0xff pattern:$0x73625140] }
  0x11   :  { %42 = vst [vmem:[#allocation1] ss:$4 sm:$0xff] %v308_v2  ;;  %v63_v12 = vsel %vm62_vm0, %v34_v4, 0.0  ;;  %v64_v13 = vsel %vm62_vm0, %v35_v5, 0.0  ;;  %v66_v14 = vsel %vm62_vm0, %v36_v6, 0.0  ;;  %v68_v16 = vsel %vm62_vm0, %v37_v7, 0.0 }
  0x12   :  { %43 = vst [vmem:[#allocation1 + $0x20] ss:$4 sm:$0xff] %v310_v3  ;;  %v65_v15 = vadd.f32 %v64_v13, %v63_v12  ;;  %v70_v18 = vsel %vm62_vm0, %v38_v8, 0.0  ;;  %v72_v20 = vsel %vm62_vm0, %v39_v9, 0.0  ;;  %v74_v22 = vsel %vm62_vm0, %v40_v10, 0.0 }
  0x13   :  { %v76_v25 = vsel %vm62_vm0, %v41_v11, 0.0  ;;  %v92_v44 = vmul.f32 1600.0, %v230_v43 }
  0x14   :  { %v67_v17 = vadd.f32 %v66_v14, %v65_v15 }
  0x15   :  { %v93_v45 = vsub.f32 1.0, %v92_v44 }
  0x16   :  { %v69_v19 = vadd.f32 %v68_v16, %v67_v17 }
  0x17   :  { %v94_v46 = vmul.f32 %v230_v43, %v93_v45 }
  0x18   :  { %v71_v21 = vadd.f32 %v70_v18, %v69_v19  ;;  %v44_v23 = vld.sshfl [vmem:[#allocation1] sm:$0xff pattern:$0x73625140]  ;;  %v45_v26 = vld.sshfl [vmem:[#allocation1 + $0x8] sm:$0xff pattern:$0x73625140] }
  0x19   :  { %v78_v28 = vsel %vm62_vm0, %v44_v23, 0.0  ;;  %v46_v29 = vld.sshfl [vmem:[#allocation1 + $0x10] sm:$0xff pattern:$0x73625140]  ;;  %v80_v31 = vsel %vm62_vm0, %v45_v26, 0.0  ;;  %v95_v47 = vadd.f32 %v230_v43, %v94_v46 }
  0x1a   :  { %v73_v24 = vadd.f32 %v72_v20, %v71_v21  ;;  %v47_v32 = vld.sshfl [vmem:[#allocation1 + $0x18] sm:$0xff pattern:$0x73625140]  ;;  %v82_v34 = vsel %vm62_vm0, %v46_v29, 0.0 }
  0x1b   :  { %v48_v35 = vld.sshfl [vmem:[#allocation1 + $0x20] sm:$0xff pattern:$0x73625140]  ;;  %v84_v37 = vsel %vm62_vm0, %v47_v32, 0.0  ;;  %v97_v50 = vsel %vm96_vm2, %v230_v43, %v95_v47 }
  0x1c   :  { %v75_v27 = vadd.f32 %v74_v22, %v73_v24  ;;  %v87_v39 = vsel %vm86_vm1, %v48_v35, 0.0 }
  0x1e   :  { %v77_v30 = vadd.f32 %v76_v25, %v75_v27 }
  0x20   :  { %v79_v33 = vadd.f32 %v78_v28, %v77_v30 }
  0x22   :  { %v81_v36 = vadd.f32 %v80_v31, %v79_v33 }
  0x24   :  { %v83_v38 = vadd.f32 %v82_v34, %v81_v36 }
  0x26   :  { %v85_v40 = vadd.f32 %v84_v37, %v83_v38 }
  0x28   :  { %v88_v41 = vadd.f32 %v87_v39, %v85_v40 }
  0x2a   :  { %89 = vadd.xlane.f32.xlu0 %v88_v41 }
  0x9d   :  { %v90_v52 = vpop.xlane.xlu0 %89 }
  0x9e   :  { %v98_v53 = vmul.f32 %v97_v50, %v90_v52 }
  0xa0   :  { %v103_v54 = vperm.slane %v98_v53, %v102_v51 }
  0xa2   :  { %v328_v55 = vsub.f32 %v302_v0, %v103_v54  ;;  %v331_v56 = vsub.f32 %v304_v1, %v103_v54  ;;  %v107_v59 = vsub.f32 %v308_v2, %v103_v54  ;;  %v337_v60 = vsub.f32 %v310_v3, %v103_v54 }
  0xa4   :  { %v109_v57 = vand.u32 2147483647, %v328_v55  ;;  %v110_v58 = vand.u32 2147483647, %v331_v56  ;;  %v111_v61 = vand.u32 2147483647, %v107_v59 }
  0xa5   :  { %v112_v62 = vand.u32 2147483647, %v337_v60  ;;  %v175_v47 = vmul.f32 0.8, %v328_v55  ;;  %v176_v49 = vmul.f32 0.8, %v331_v56 }
  0xa6   :  { %117 = vst [vmem:[#allocation1] ss:$4 sm:$0xff] %v109_v57  ;;  %v177_v50 = vmul.f32 0.8, %v107_v59 }
  0xa7   :  { %119 = vst [vmem:[#allocation1 + $0x20] ss:$4 sm:$0xff] %v110_v58 }
  0xad   :  { %v120_v63 = vld.sshfl [vmem:[#allocation1] sm:$0xff pattern:$0x73625140]  ;;  %v121_v0 = vld.sshfl [vmem:[#allocation1 + $0x8] sm:$0xff pattern:$0x73625140] }
  0xae   :  { %v122_v4 = vld.sshfl [vmem:[#allocation1 + $0x10] sm:$0xff pattern:$0x73625140]  ;;  %v123_v5 = vld.sshfl [vmem:[#allocation1 + $0x18] sm:$0xff pattern:$0x73625140] }
  0xaf   :  { %v124_v1 = vld.sshfl [vmem:[#allocation1 + $0x20] sm:$0xff pattern:$0x73625140]  ;;  %v125_v6 = vld.sshfl [vmem:[#allocation1 + $0x28] sm:$0xff pattern:$0x73625140] }
  0xb0   :  { %v126_v7 = vld.sshfl [vmem:[#allocation1 + $0x30] sm:$0xff pattern:$0x73625140]  ;;  %v127_v8 = vld.sshfl [vmem:[#allocation1 + $0x38] sm:$0xff pattern:$0x73625140] }
  0xb1   :  { %128 = vst [vmem:[#allocation1] ss:$4 sm:$0xff] %v111_v61  ;;  %v148_v9 = vsel %vm62_vm0, %v120_v63, -inf  ;;  %v150_v2 = vsel %vm62_vm0, %v122_v4, -inf  ;;  %v152_v3 = vsel %vm62_vm0, %v124_v1, -inf  ;;  %v156_v10 = vsel %vm62_vm0, %v126_v7, -inf }
  0xb2   :  { %129 = vst [vmem:[#allocation1 + $0x20] ss:$4 sm:$0xff] %v112_v62  ;;  %v149_v11 = vsel %vm62_vm0, %v121_v0, -inf  ;;  %v151_v12 = vsel %vm62_vm0, %v123_v5, -inf  ;;  %v154_v13 = vsel %vm62_vm0, %v125_v6, -inf  ;;  %v158_v14 = vsel %vm62_vm0, %v127_v8, -inf }
  0xb3   :  { %v153_v19 = vmax.f32 %v148_v9, %v152_v3  ;;  %v157_v20 = vmax.f32 %v150_v2, %v156_v10  ;;  %v159_v22 = vmax.f32 %v151_v12, %v158_v14  ;;  %v155_v26 = vmax.f32 %v149_v11, %v154_v13 }
  0xb8   :  { %v130_v15 = vld.sshfl [vmem:[#allocation1] sm:$0xff pattern:$0x73625140]  ;;  %v131_v16 = vld.sshfl [vmem:[#allocation1 + $0x8] sm:$0xff pattern:$0x73625140] }
  0xb9   :  { %v132_v17 = vld.sshfl [vmem:[#allocation1 + $0x10] sm:$0xff pattern:$0x73625140]  ;;  %v133_v18 = vld.sshfl [vmem:[#allocation1 + $0x18] sm:$0xff pattern:$0x73625140] }
  0xba   :  { %v134_v21 = vld.sshfl [vmem:[#allocation1 + $0x20] sm:$0xff pattern:$0x73625140]  ;;  %v160_v23 = vsel %vm62_vm0, %v130_v15, -inf  ;;  %v162_v24 = vsel %vm62_vm0, %v131_v16, -inf  ;;  %v164_v25 = vsel %vm62_vm0, %v132_v17, -inf }
  0xbb   :  { %v161_v27 = vmax.f32 %v153_v19, %v160_v23  ;;  %v165_v28 = vmax.f32 %v157_v20, %v164_v25  ;;  %v166_v29 = vsel %vm62_vm0, %v133_v18, -inf  ;;  %v168_v31 = vsel %vm86_vm1, %v134_v21, -inf }
  0xbc   :  { %v167_v30 = vmax.f32 %v159_v22, %v166_v29  ;;  %v163_v32 = vmax.f32 %v155_v26, %v162_v24 }
  0xbd   :  { %v169_v33 = vmax.f32 %v161_v27, %v168_v31 }
  0xbe   :  { %v171_v35 = vmax.f32 %v165_v28, %v167_v30 }
  0xbf   :  { %v170_v34 = vmax.f32 %v169_v33, %v163_v32 }
  0xc1   :  { %v172_v36 = vmax.f32 %v170_v34, %v171_v35 }
  0xc3   :  { %173 = vmax.xlane.f32.xlu0 %v172_v36 }
 0x136   :  { %v174_v37 = vpop.xlane.xlu0 %173 }
 0x137   :  { %v179_v38 = vadd.f32 1e-09, %v174_v37 }
 0x139   :  { %v184_v39 = vperm.slane %v179_v38, %v102_v51  ;;  %v178_v51 = vmul.f32 0.8, %v337_v60 }
 0x13b   :  { %231 = vrcp.f32 %v184_v39  ;;  %v197_v43 = vand.u32 2147483648, %v184_v39  ;;  %v195_v45 = vand.u32 2147483647, %v184_v39  ;;  %vm191_vm4 = vweird.f32 %v184_v39 }
 0x13d   :  { %v198_v48 = vor.u32 1.1754944e-38, %v197_v43  ;;  %vm196_vm6 = vcmp.eq.f32.partialorder %v195_v45, 8.507059e+37 }
 0x141   :  { %v232_v40 = vpop.eup %231 }
 0x142   :  { %v187_v41 = vmul.f32 %v232_v40, %v184_v39  ;;  %vm192_vm3 = vweird.f32 %v232_v40 }
 0x143   :  { %vm193_vm5 = vmor %vm191_vm4, %vm192_vm3 }
 0x144   :  { %v188_v42 = vsub.f32 1.0, %v187_v41 }
 0x146   :  { %v189_v44 = vmul.f32 %v232_v40, %v188_v42 }
 0x148   :  { %v190_v46 = vadd.f32 %v232_v40, %v189_v44 }
 0x14a   :  { %v194_v52 = vsel %vm193_vm5, %v232_v40, %v190_v46 }
 0x14b   :  { %v199_v53 = vsel %vm196_vm6, %v198_v48, %v194_v52 }
 0x14c   :  { %v200_v54 = vmul.f32 %v199_v53, %v175_v47  ;;  %v201_v57 = vmul.f32 %v199_v53, %v176_v49  ;;  %v202_v58 = vmul.f32 %v199_v53, %v177_v50  ;;  %v203_v55 = vmul.f32 %v199_v53, %v178_v51 }
 0x14e   :  { %204 = vst [vmem:[#allocation5] sm:$0xff] %v200_v54 }
 0x14f   :  { %205 = vst [vmem:[#allocation5 + $0x8] sm:$0xff] %v201_v57 }
 0x150   :  { %206 = vst [vmem:[#allocation5 + $0x10] sm:$0xff] %v202_v58 }
 0x151   :  { %207 = vst.msk [vmem:[#allocation5 + $0x18] sm:$0x3] %vm86_vm1, %v203_v55 }
 0x152   :  { %218 = dma.vmem_to_hbm [thread:$0]  %s214_s11, 416, %s216_s14, [#allocation4]  }
 0x153   :  { %283 = dma.done.wait [#allocation4], 416  }
 0x154   :  { %284 = vsyncadd [#allocation4], 4294966880 }
 0x155   :  { %223 = vsyncpa [#allocation3], 1 }
 0x156   :  { %224 = vsyncpa [#allocation4], 1 }

</bundles_post_ra>
